<compile_context>
chip_gen: v7x
topology: tpu7x:2x2x1
jax: 0.10.0
libtpu: 0.0.40
codegen_flags: <defaults>
</compile_context>

<pallas_src>
import numpy as np
import jax
import jax.numpy as jnp
from jax import lax
from jax.experimental import pallas as pl
from jax.experimental.pallas import tpu as pltpu

# ---- "module __init__" parameters (deterministic, no checkpoint) ----------
NUM_OUTPUTS = 64                       # action_space.shape[0]
NUM_INPUTS = NUM_OUTPUTS * 2           # 2 * num_outputs  (= 128, one full lane width)
MIN_STD = 0.01
INIT_STD = 1.0
RAW_INIT_STD = float(np.log(np.exp(INIT_STD) - 1.0))   # log(e^1 - 1)

# Keep double-buffered VMEM footprint well under v7x's 64 MiB physical VMEM.
_MAX_TILE_B = 4096


def _normal_head_kernel(x_ref, out_ref):
    """Elementwise hot path on the VPU/EUP, one lane-dense 128-wide store."""
    a = x_ref.shape[-1] // 2
    x = x_ref[...].astype(jnp.float32)              # (tb, 2A), f32 compute
    shifted = x + RAW_INIT_STD
    # numerically-stable softplus: log1p(exp(-|y|)) + max(y, 0)
    std = jnp.log1p(jnp.exp(-jnp.abs(shifted))) + jnp.maximum(shifted, 0.0) + MIN_STD
    # Packed output: lanes [0, A) carry mean (= x), lanes [A, 2A) carry std.
    lane = lax.broadcasted_iota(jnp.int32, x.shape, dimension=1)
    packed = jnp.where(lane < a, x, std)
    out_ref[...] = packed.astype(out_ref.dtype)


def normal_head(x: jax.Array, *, tile_b: int = 1024):
    """Returns (mean, std) of the diagonal Gaussian, like NormalHead.forward."""
    assert x.ndim == 2 and x.shape[-1] == NUM_INPUTS
    b = x.shape[0]

    # min sublane tile: 8 for f32, 16 for 16-bit dtypes
    sub = 8 if x.dtype == jnp.float32 else 16

    # Pick the row tile: big enough to amortize per-step overhead, clamped to
    # the batch and to a VMEM-safe ceiling; keep >=2 grid steps when the batch
    # allows so the single 'parallel' axis can span both v7x TensorCores.
    tb = max(sub, min(tile_b, b, _MAX_TILE_B))
    tb = ((tb + sub - 1) // sub) * sub
    if tb >= b and b >= 2 * sub:
        tb = ((pl.cdiv(b, 2) + sub - 1) // sub) * sub

    grid_b = pl.cdiv(b, tb)
    padded_b = grid_b * tb
    xp = x if padded_b == b else jnp.pad(x, ((0, padded_b - b), (0, 0)))

    packed = pl.pallas_call(
        _normal_head_kernel,
        out_shape=jax.ShapeDtypeStruct((padded_b, NUM_INPUTS), x.dtype),
        grid_spec=pltpu.PrefetchScalarGridSpec(
            num_scalar_prefetch=0,
            grid=(grid_b,),
            in_specs=[pl.BlockSpec((tb, NUM_INPUTS), lambda i: (i, 0))],
            out_specs=pl.BlockSpec((tb, NUM_INPUTS), lambda i: (i, 0)),
        ),
        compiler_params=pltpu.CompilerParams(
            dimension_semantics=("parallel",)),
    )(xp)

    packed = packed[:b]
    mean = packed[:, :NUM_OUTPUTS]
    std = packed[:, NUM_OUTPUTS:]
    return mean, std


if __name__ == "__main__":
    key = jax.random.PRNGKey(0)

    def _check(batch, dtype=jnp.float32):
        x = jax.random.normal(key, (batch, NUM_INPUTS), dtype=jnp.float32).astype(dtype)
        mean, std = normal_head(x)
        jax.block_until_ready((mean, std))

        # reference (plain JAX) check of the forward semantics, in f32
        xf = x.astype(jnp.float32)
        ref_mean = xf[:, :NUM_OUTPUTS]
        ref_std = jax.nn.softplus(xf[:, NUM_OUTPUTS:] + RAW_INIT_STD) + MIN_STD
        tol = 1e-5 if dtype == jnp.float32 else 2e-2
        np.testing.assert_allclose(np.asarray(mean, dtype=np.float32),
                                   np.asarray(ref_mean), rtol=tol, atol=tol)
        np.testing.assert_allclose(np.asarray(std, dtype=np.float32),
                                   np.asarray(ref_std), rtol=tol, atol=tol)

        # mode() of IndependentWithMode(NormalWithMode(mean, std), 1) == mean
        mode = mean
        assert mode.shape == (batch, NUM_OUTPUTS)

    _check(16)                 # small batch, 2 grid steps
    _check(13)                 # odd batch -> padding path
    _check(16, jnp.bfloat16)   # bf16 input, f32 compute inside kernel

    print("KERNEL_OK")
</pallas_src>

<mosaic_0001>
module attributes {stable_mosaic.version = 11 : i64} {
  func.func @_normal_head_kernel(%arg0: i32, %arg1: memref<8x128xf32, #tpu.memory_space<vmem>>, %arg2: memref<8x128xf32, #tpu.memory_space<vmem>>) attributes {dimension_semantics = [#tpu.dimension_semantics<parallel>], iteration_bounds = array<i64: 2>, scalar_prefetch = 0 : i64, scratch_operands = 0 : i64, tpu.core_type = #tpu.core_type<tc>, window_params = [{transform_indices = @transform_0, window_bounds = array<i64: 8, 128>}, {transform_indices = @transform_1, window_bounds = array<i64: 8, 128>}]} {
    %c0 = arith.constant 0 : index
    %c0_0 = arith.constant 0 : index
    %0 = vector.load %arg1[%c0, %c0_0] : memref<8x128xf32, #tpu.memory_space<vmem>>, vector<8x128xf32>
    %cst = arith.constant 0.541324854 : f32
    %1 = vector.broadcast %cst : f32 to vector<8x128xf32>
    %2 = arith.addf %0, %1 : vector<8x128xf32>
    %3 = math.absf %2 : vector<8x128xf32>
    %cst_1 = arith.constant 0.000000e+00 : f32
    %4 = vector.broadcast %cst_1 : f32 to vector<8x128xf32>
    %5 = arith.subf %4, %3 : vector<8x128xf32>
    %6 = math.exp %5 : vector<8x128xf32>
    %7 = math.log1p %6 : vector<8x128xf32>
    %cst_2 = arith.constant 0.000000e+00 : f32
    %8 = vector.broadcast %cst_2 : f32 to vector<8x128xf32>
    %9 = arith.maximumf %2, %8 : vector<8x128xf32>
    %10 = arith.addf %7, %9 : vector<8x128xf32>
    %cst_3 = arith.constant 0.00999999977 : f32
    %11 = vector.broadcast %cst_3 : f32 to vector<8x128xf32>
    %12 = arith.addf %10, %11 : vector<8x128xf32>
    %13 = tpu.iota {dimensions = array<i32: 1>} : vector<8x128xi32>
    %c64_i32 = arith.constant 64 : i32
    %14 = vector.broadcast %c64_i32 : i32 to vector<8x128xi32>
    %15 = arith.cmpi slt, %13, %14 : vector<8x128xi32>
    %16 = arith.select %15, %0, %12 : vector<8x128xi1>, vector<8x128xf32>
    %c0_4 = arith.constant 0 : index
    %c0_5 = arith.constant 0 : index
    %17 = vector.load %arg2[%c0_4, %c0_5] : memref<8x128xf32, #tpu.memory_space<vmem>>, vector<8x128xf32>
    tpu.vector_store %arg2[%c0_4, %c0_5], %16 {strides = array<i32>} : memref<8x128xf32, #tpu.memory_space<vmem>>, vector<8x128xf32>,
    return
  }
  func.func @transform_0(%arg0: i32) -> (i32, i32) {
    %c0_i32 = arith.constant 0 : i32
    %c0_i32_0 = arith.constant 0 : i32
    return %arg0, %c0_i32 : i32, i32
  }
  func.func @transform_1(%arg0: i32) -> (i32, i32) {
    %c0_i32 = arith.constant 0 : i32
    %c0_i32_0 = arith.constant 0 : i32
    return %arg0, %c0_i32 : i32, i32
  }
}

</mosaic_0001>

<bundles_post_ra>
// kernel: tpu_custom_call.1
= control target key start
LH: loop header
LB: loop body
LE: loop exit
PB: predicated region body
PF: predicated region fallthrough
CT: control target
= control target key end

     0   :  { %6 = vsyncpa [#allocation3], 0  ;;  %s572_s0 = inlined_call_operand.hbm [shape: f32[16,128], index: 0, kind: input, shape index: {}]   ;;  %s573_s1 = inlined_call_operand.hbm [shape: f32[16,128], index: 1, kind: output, shape index: {}]  }
   0x1   :  { %8 = vsyncpa [#allocation3 + $0x1], 0 }
   0x2   :  { %9 = vsyncpa [#allocation4], 0 }
   0x3   :  { %11 = vsyncpa [#allocation4 + $0x1], 0  ;;  %s411_s6 = smov 0   ;;  %s413_s7 = smov 0  }
   0x4   :  { %s415_s8 = smov 0   ;;  %s417_s9 = smov 0  }
   0x5 LB: > { %s432_s10 = sadd.s32 4294967295, %s397_s9   ;;  %s239_s11 = sadd.s32 4294967294, %s397_s9   ;;  %s397_s9 = sphi %s417_s9, %s588_s9   ;;  %s393_s8 = sphi %s415_s8, %s587_s8   ;;  %s389_s7 = sphi %s413_s7, %s586_s7   ;;  %s385_s6 = sphi %s411_s6, %s585_s6  }
   0x6   : > { %s436_s12 = sadd.s32 1, %s397_s9   ;;  %s24_s13 = sadd.s32 1, %s393_s8 }
   0x7   : > { %s21_s14 = ssub.s32 %s397_s9, %s436_s12  ;;  %p31_p0 = scmp.ne.s32.totalorder %s393_s8, %s389_s7 }
   0x8   : > { %p22_p1 = scmp.eq.s32.totalorder %s21_s14, 0  ;;  %p32_p2 = scmp.eq.s32.totalorder %s397_s9, 0 }
   0x9   : > { %p37_p3 = scmp.ne.s32.totalorder %s389_s7, %s385_s6  ;;  %p38_p4 = scmp.eq.s32.totalorder %s432_s10, 0 }
   0xa   : > { %s448_s15 = scalar_select %p22_p1, %s393_s8, %s24_s13  }
   0xb   : > { %p450_p5 = por %p32_p2, %p31_p0  ;;  %p454_p6 = por %p38_p4, %p37_p3 }
   0xc   : > { %p61_p7 = scmp.eq.s32.totalorder %s432_s10, 1  ;;  %p67_p8 = scmp.eq.s32.totalorder %s239_s11, 1 }
   0xd   : > { %p263_p10 = scmp.lt.s32.totalorder %s397_s9, 2  ;;  %s87_s20 = sand.u32 1, %s393_s8  }
   0xe   : > { %p461_p11 = por %p61_p7, %p31_p0  ;;  %p465_p12 = por %p67_p8, %p37_p3 }
   0xf   : > { %s243_s21 = sshll.u32 %s397_s9, 7  ;;  %s242_s22 = sshll.u32 %s87_s20, 3 }
  0x10   : > { %s577_s18 = scalar_select %p461_p11, 1, 0 }
  0x11   : > { %s578_s19 = scalar_select %p465_p12, 1, 0 }
  0x12   : > { %s474_s25 = scalar_lea.hbm %s572_s0, %s243_s21  ;;  %s91_s26 = scalar_lea.vmem [#allocation2], %s242_s22 }
  0x13   : > { %s98_s27 = sshll.u32 %s91_s26, 4  ;;  %p478_p13 = pnand %p263_p10, %p450_p5  ;;  %s482_s27 = int_to_ptr.vmem [resolvable:$true] %s98_s27 }
  0x14   : > { %s88_s29 = scalar_lea.sflag [#allocation3], %s87_s20  ;;  %s301_s30 = scalar_lea.hbm %s474_s25, 128 }
  0x15   : > { %p302_p2 = scmp.ne.s32.totalorder %s474_s25, %s301_s30  ;;  %p303_p3 = pneg %p478_p13 }
  0x16   : > { %s306_s4 = scalar_lea.hbm %s572_s0, 256  ;;  %p307_p5 = scmp.lt.u32.totalorder %s474_s25, %s572_s0 }
  0x17   : > { %p304_p4 = pnand %p303_p3, %p302_p2  ;;  %p308_p8 = scmp.lt.u32.totalorder %s306_s4, %s301_s30 }
  0x18   : > { %p310_p9 = scmp.lt.u32.totalorder %s301_s30, %s474_s25 }
  0x19   : > { %p305_p7 = pneg %p304_p4  ;;  %p309_p10 = por %p308_p8, %p307_p5 }
  0x1b   : > { %p311_p0 = por %p310_p9, %p309_p10 }
  0x1d   : > { %p312_p1 = pnand %p311_p0, %p305_p7 }
  0x1f   : > { %315 = shalt.err (!%p312_p1)
}
  0x20   : > { %s316_s13 = scalar_lea.vmem %s482_s27, 128  ;;  %s399_s14 = smov [#allocation2]  }
  0x21   : > { %p317_p2 = scmp.ne.s32.totalorder %s482_s27, %s316_s13  ;;  %s321_s16 = sshll.u32 %s399_s14, 4  ;;  %s322_s16 = int_to_ptr.vmem [resolvable:$false] %s321_s16 }
  0x22   : > { %s323_s20 = scalar_lea.vmem %s322_s16, 256  ;;  %p324_p11 = scmp.lt.s32.totalorder %s482_s27, %s322_s16 }
  0x23   : > { %p319_p4 = pnand %p317_p2, %p303_p3  ;;  %p325_p5 = scmp.lt.s32.totalorder %s323_s20, %s316_s13 }
  0x25   : > { %p320_p12 = pneg %p319_p4  ;;  %p326_p8 = por %p325_p5, %p324_p11 }
  0x27   : > { %p327_p9 = pnand %p326_p8, %p320_p12 }
  0x29   : > { %330 = shalt.err (!%p327_p9)
}
  0x2a   : > { %258 = dma.hbm_to_vmem [thread:$0]  (!%p478_p13), %s474_s25, 128, %s482_s27, %s88_s29  }
  0x2b   : > { %p580_p0 = scmp.lt.s32.totalorder %s397_s9, 3  ;;  %p581_p1 = scmp.ge.s32.totalorder %s397_s9, 1 }
  0x2d   : > { %p104_p3 = pnand %p581_p1, %p580_p0 }
  0x2e   : > { %s516_s21 = sand.u32 (!%p104_p3), 1, %s389_s7  }
  0x2f   : > { %107 = sbr.rel (%p104_p3) target bundleno = 110 (0x6e), region = 24  ;;  %s245_s22 = sshll.u32 (!%p104_p3), %s516_s21, 3 }
  0x30   : > { %s110_s23 = scalar_lea.sflag (!%p104_p3), [#allocation3], %s516_s21  ;;  %s113_s24 = scalar_lea.vmem (!%p104_p3), [#allocation2], %s245_s22 }
  0x36   : > { %376 = dma.done.wait (%p454_p6), %s110_s23, 128  }
  0x37   : > { %378 = vsyncadd (%p454_p6), %s110_s23, 4294967168  ;;  %v132_v0 = vld [vmem:[%s113_s24] sm:$0xff]  ;;  %v150_v10 = vlaneseq  ;;  %s131_s17 = scalar_lea.vmem [#allocation5], %s245_s22  ;;  %s248_s26 = sshll.u32 %s432_s10, 7 }
  0x38   : > { %v133_v1 = vadd.f32 0.54132485, %v132_v0  ;;  %s169_s25 = sshll.u32 %s131_s17, 4  ;;  %s530_s29 = scalar_lea.hbm %s573_s1, %s248_s26  ;;  %s525_s25 = int_to_ptr.vmem [resolvable:$true] %s169_s25 }
  0x39   : > { %v151_v15 = vand.u32 127, %v150_v10  ;;  %s156_s30 = scalar_lea.sflag [#allocation4], %s516_s21  ;;  %s331_s2 = scalar_lea.vmem %s525_s25, 128 }
  0x3a   : > { %v134_v2 = vand.u32 2147483647, %v133_v1  ;;  %v147_v13 = vmax.f32 %v133_v1, 0.0  ;;  %p332_p6 = scmp.ne.s32.totalorder %s525_s25, %s331_s2  ;;  %p582_p11 = scmp.ne.s32.totalorder %s577_s18, 0 }
  0x3b   : > { %vm152_vm1 = vcmp.lt.s32.totalorder %v151_v15, 64  ;;  %s400_s10 = smov [#allocation5]  }
  0x3c   : > { %v135_v3 = vsub.f32 0.0, %v134_v2  ;;  %p333_p12 = pnand %p332_p6, %p582_p11  ;;  %s335_s3 = sshll.u32 %s400_s10, 4  ;;  %s336_s3 = int_to_ptr.vmem [resolvable:$false] %s335_s3 }
  0x3d   : > { %s337_s4 = scalar_lea.vmem %s336_s3, 256  ;;  %p338_p7 = scmp.lt.s32.totalorder %s525_s25, %s336_s3 }
  0x3e   : > { %v136_v4 = vmul.f32 1.442695, %v135_v3  ;;  %p334_p13 = pneg %p333_p12  ;;  %p339_p10 = scmp.lt.s32.totalorder %s337_s4, %s331_s2 }
  0x40   : > { %297 = vpow2.f32 %v136_v4  ;;  %p340_p2 = por %p339_p10, %p338_p7 }
  0x42   : > { %p341_p4 = pnand %p340_p2, %p334_p13 }
  0x4a   : > { %v298_v5 = vpop.eup %297 }
  0x4b   : > { %v138_v6 = vadd.f32 1.0, %v298_v5  ;;  %v141_v7 = vmul.f32 -0.5, %v298_v5  ;;  %v144_v9 = vand.u32 2147483647, %v298_v5 }
  0x4d   : > { %299 = vlog2.f32 %v138_v6  ;;  %v142_v8 = vadd.f32 1.0, %v141_v7  ;;  %vm145_vm0 = vcmp.lt.f32.partialorder %v144_v9, 0.0004427343 }
  0x4f   : > { %v143_v11 = vmul.f32 %v298_v5, %v142_v8 }
  0x57   : > { %v300_v12 = vpop.eup %299 }
  0x58   : > { %v140_v14 = vmul.f32 0.6931472, %v300_v12 }
  0x5a   : > { %v146_v16 = vsel %vm145_vm0, %v143_v11, %v140_v14 }
  0x5b   : > { %v148_v17 = vadd.f32 %v147_v13, %v146_v16 }
  0x5d   : > { %v149_v18 = vadd.f32 0.01, %v148_v17 }
  0x5f   : > { %v153_v19 = vsel %vm152_vm1, %v132_v0, %v149_v18 }
  0x60   : > { %154 = vst [vmem:[%s131_s17] sm:$0xff] %v153_v19 }
  0x61   : > { %344 = shalt.err (!%p341_p4)
}
  0x62   : > { %s345_s5 = scalar_lea.hbm %s530_s29, 128  ;;  %s349_s14 = scalar_lea.hbm %s573_s1, 256 }
  0x63   : > { %p346_p5 = scmp.ne.s32.totalorder %s530_s29, %s345_s5  ;;  %p350_p0 = scmp.lt.u32.totalorder %s530_s29, %s573_s1 }
  0x64   : > { %p351_p1 = scmp.lt.u32.totalorder %s349_s14, %s345_s5  ;;  %p353_p6 = scmp.lt.u32.totalorder %s345_s5, %s530_s29 }
  0x65   : > { %p347_p8 = pnand %p346_p5, %p582_p11 }
  0x66   : > { %p352_p3 = por %p351_p1, %p350_p0 }
  0x67   : > { %p348_p9 = pneg %p347_p8 }
  0x68   : > { %p354_p12 = por %p353_p6, %p352_p3 }
  0x6a   : > { %p355_p13 = pnand %p354_p12, %p348_p9 }
  0x6c   : > { %358 = shalt.err (!%p355_p13)
}
  0x6d   : > { %253 = dma.vmem_to_hbm [thread:$0]  (%p582_p11), %s525_s25, 128, %s530_s29, %s156_s30  }
  0x6e PF: > { %s181_s21 = sand.u32 1, %s385_s6   ;;  %p583_p7 = scmp.ne.s32.totalorder %s578_s19, 0 }
  0x6f   : > { %p584_p10 = scmp.ge.s32.totalorder %s397_s9, 2  ;;  %s182_s22 = scalar_lea.sflag [#allocation4], %s181_s21 }
  0x71   : > { %p260_p2 = pnand %p584_p10, %p583_p7 }
  0x73   : > { %380 = dma.done.wait (!%p260_p2), %s182_s22, 128  }
  0x74   : > { %382 = vsyncadd (!%p260_p2), %s182_s22, 4294967168  ;;  %p14_p4 = scmp.ge.s32.totalorder %s436_s12, 4   ;;  %s585_s6 = smov %s389_s7 }
  0x75   : > { %s586_s7 = smov %s393_s8  ;;  %s587_s8 = smov %s448_s15 }
  0x76   : > { %s588_s9 = smov %s436_s12  ;;  %16 = sbr.rel (!%p14_p4) target bundleno = 5 (0x5), region = 69 }
  0x7d   :  { %187 = vsyncpa [#allocation3], 1 }
  0x7e   :  { %189 = vsyncpa [#allocation3 + $0x1], 1 }
  0x7f   :  { %190 = vsyncpa [#allocation4], 1 }
  0x80   :  { %192 = vsyncpa [#allocation4 + $0x1], 1 }

</bundles_post_ra>
